<compile_context>
chip_gen: v7x
topology: tpu7x:2x2x1
jax: 0.10.0
libtpu: 0.0.40
codegen_flags: <defaults>
</compile_context>

<pallas_src>
import functools
import numpy as np

import jax
import jax.numpy as jnp
from jax import lax
from jax.experimental import pallas as pl
from jax.experimental.pallas import tpu as pltpu

NUM_CLASSES = 3
BN_EPS = 1e-5


def _round_up(x, m):
    return (x + m - 1) // m * m


def _choose_tm(m):
    """Row tile: full (16-aligned) block when small, else a clean divisor, else 256+pad."""
    if m <= 512:
        return _round_up(m, 16)
    for t in (512, 256, 128):
        if m % t == 0:
            return t
    return 256


def _choose_tile(d):
    """Lane-dim tile for a dimension that is already a multiple of 128."""
    for t in (512, 256, 128):
        if d % t == 0:
            return t
    return 128


# --------------------------------------------------------------------------
# Generic fused matmul kernel:
#   out[m, n] = epilogue( sum_{t,k} A[t, m, k] @ B[t, k, n] )
#   epilogue:  y = acc*scale + shift (+ residual) (+ ReLU) (+ sigmoid)
# Grid: (M/TM, N/TN, T, K/TK); output block is resident across the (t, k) reduction.
# --------------------------------------------------------------------------
@functools.lru_cache(maxsize=None)
def _fused_matmul_call(T, Mp, Kp, Np, TM, TK, TN, has_res, relu, sigmoid):
    grid = (Mp // TM, Np // TN, T, Kp // TK)

    def kernel(*refs):
        if has_res:
            a_ref, b_ref, s_ref, h_ref, r_ref, o_ref = refs
        else:
            a_ref, b_ref, s_ref, h_ref, o_ref = refs
            r_ref = None
        t = pl.program_id(2)
        k = pl.program_id(3)

        @pl.when((t == 0) & (k == 0))
        def _init():
            o_ref[...] = jnp.zeros_like(o_ref)

        o_ref[...] += jnp.dot(a_ref[...], b_ref[...],
                              preferred_element_type=jnp.float32)

        @pl.when((t == pl.num_programs(2) - 1) & (k == pl.num_programs(3) - 1))
        def _epilogue():
            y = o_ref[...] * s_ref[...] + h_ref[...]
            if has_res:
                y = y + r_ref[...]
            if relu:
                y = jnp.maximum(y, 0.0)
            if sigmoid:
                y = 1.0 / (1.0 + jnp.exp(-y))
            o_ref[...] = y

    in_specs = [
        pl.BlockSpec((None, TM, TK), lambda m, n, t, k: (t, m, k)),
        pl.BlockSpec((None, TK, TN), lambda m, n, t, k: (t, k, n)),
        pl.BlockSpec((1, TN), lambda m, n, t, k: (0, n)),
        pl.BlockSpec((1, TN), lambda m, n, t, k: (0, n)),
    ]
    if has_res:
        in_specs.append(pl.BlockSpec((TM, TN), lambda m, n, t, k: (m, n)))

    f = pl.pallas_call(
        kernel,
        out_shape=jax.ShapeDtypeStruct((Mp, Np), jnp.float32),
        grid_spec=pltpu.PrefetchScalarGridSpec(
            num_scalar_prefetch=0,
            grid=grid,
            in_specs=in_specs,
            out_specs=pl.BlockSpec((TM, TN), lambda m, n, t, k: (m, n)),
        ),
        compiler_params=pltpu.CompilerParams(
            dimension_semantics=("parallel", "parallel", "arbitrary", "arbitrary")),
    )
    return jax.jit(f)


def fused_matmul(a3, b3, scale=None, shift=None, residual=None,
                 relu=False, sigmoid=False):
    """a3: (T, M, K); b3: (T, K, N); scale/shift: (N,) f32; residual: (M, N) f32."""
    T, M, K = a3.shape
    Ncols = b3.shape[2]

    Kp = _round_up(K, 128)
    Np = _round_up(Ncols, 128)
    TM = _choose_tm(M)
    Mp = _round_up(M, TM)
    TK = _choose_tile(Kp)
    TN = _choose_tile(Np)

    if (Mp, Kp) != (M, K):
        a3 = jnp.pad(a3, ((0, 0), (0, Mp - M), (0, Kp - K)))
    if (Kp, Np) != (K, Ncols):
        b3 = jnp.pad(b3, ((0, 0), (0, Kp - K), (0, Np - Ncols)))
    a3 = a3.astype(jnp.bfloat16)
    b3 = b3.astype(jnp.bfloat16)

    if scale is None:
        scale = jnp.ones((Ncols,), jnp.float32)
    if shift is None:
        shift = jnp.zeros((Ncols,), jnp.float32)
    scale = jnp.pad(scale.astype(jnp.float32), (0, Np - Ncols)).reshape(1, Np)
    shift = jnp.pad(shift.astype(jnp.float32), (0, Np - Ncols)).reshape(1, Np)

    args = [a3, b3, scale, shift]
    has_res = residual is not None
    if has_res:
        r = residual.astype(jnp.float32)
        if r.shape != (Mp, Np):
            r = jnp.pad(r, ((0, Mp - M), (0, Np - Ncols)))
        args.append(r)

    out = _fused_matmul_call(T, Mp, Kp, Np, TM, TK, TN,
                             has_res, bool(relu), bool(sigmoid))(*args)
    if (Mp, Np) != (M, Ncols):
        out = out[:M, :Ncols]
    return out


# --------------------------------------------------------------------------
# Conv (+ fused bias/BN/residual/ReLU) wrapper
# --------------------------------------------------------------------------
def conv_bn(x, w, bn=None, stride=1, padding=0, dilation=1,
            relu=False, residual=None, bias=None, sigmoid=False):
    """x: (N,H,W,Cin) NHWC f32; w: (kh,kw,Cin,Cout). Returns NHWC f32."""
    N, H, W, Cin = x.shape
    kh, kw, _, Cout = w.shape
    Ho = (H + 2 * padding - dilation * (kh - 1) - 1) // stride + 1
    Wo = (W + 2 * padding - dilation * (kw - 1) - 1) // stride + 1
    M = N * Ho * Wo

    if kh == 1 and kw == 1:
        a3 = x[:, ::stride, ::stride, :].reshape(1, M, Cin)
        b3 = w.reshape(1, Cin, Cout)
    else:
        xp = jnp.pad(x, ((0, 0), (padding, padding), (padding, padding), (0, 0)))
        taps = []
        for i in range(kh):
            for j in range(kw):
                taps.append(lax.slice(
                    xp,
                    (0, i * dilation, j * dilation, 0),
                    (N, i * dilation + (Ho - 1) * stride + 1,
                     j * dilation + (Wo - 1) * stride + 1, Cin),
                    (1, stride, stride, 1)))
        if Cin % 128 == 0:
            # one reduction-grid tap per (i, j): K = Cin, no K padding.
            a3 = jnp.stack(taps, axis=0).reshape(kh * kw, M, Cin)
            b3 = w.reshape(kh * kw, Cin, Cout)
        else:
            # small Cin (stem): merge the taps into the K dimension.
            a3 = jnp.stack(taps, axis=3).reshape(1, M, kh * kw * Cin)
            b3 = w.reshape(1, kh * kw * Cin, Cout)
        # TODO(synk): tap operands are still materialized in HBM (jnp.stack); shifted-window
        # index_maps reading the padded activation directly would remove this kxk A blow-up.

    if bn is not None:
        scale = bn['gamma'] * lax.rsqrt(bn['var'] + BN_EPS)
        shift = bn['beta'] - bn['mean'] * scale
    elif bias is not None:
        scale = jnp.ones_like(bias)
        shift = bias
    else:
        scale = shift = None

    res2 = residual.reshape(M, Cout) if residual is not None else None
    out = fused_matmul(a3, b3, scale, shift, residual=res2,
                       relu=relu, sigmoid=sigmoid)
    return out.reshape(N, Ho, Wo, Cout)


# --------------------------------------------------------------------------
# 3x3 / stride-2 / pad-1 max pool (tiled Pallas reduction over 9 windows)
# --------------------------------------------------------------------------
@functools.lru_cache(maxsize=None)
def _max9_call(Mp, C, TMB):
    def kernel(x_ref, o_ref):
        o_ref[...] = jnp.max(x_ref[...], axis=0)

    return jax.jit(pl.pallas_call(
        kernel,
        out_shape=jax.ShapeDtypeStruct((Mp, C), jnp.float32),
        grid_spec=pltpu.PrefetchScalarGridSpec(
            num_scalar_prefetch=0,
            grid=(Mp // TMB,),
            in_specs=[pl.BlockSpec((9, TMB, C), lambda i: (0, i, 0))],
            out_specs=pl.BlockSpec((TMB, C), lambda i: (i, 0)),
        ),
        compiler_params=pltpu.CompilerParams(dimension_semantics=("parallel",)),
    ))


def maxpool3x3_s2_p1(x):
    N, H, W, C = x.shape
    Ho = (H + 2 - 3) // 2 + 1
    Wo = (W + 2 - 3) // 2 + 1
    xp = jnp.pad(x, ((0, 0), (1, 1), (1, 1), (0, 0)), constant_values=-jnp.inf)
    wins = []
    for i in range(3):
        for j in range(3):
            wins.append(lax.slice(
                xp, (0, i, j, 0),
                (N, i + (Ho - 1) * 2 + 1, j + (Wo - 1) * 2 + 1, C),
                (1, 2, 2, 1)))
    M = N * Ho * Wo
    stacked = jnp.stack(wins, axis=0).reshape(9, M, C)
    TMB = _choose_tm(M)
    Mp = _round_up(M, TMB)
    if Mp != M:
        stacked = jnp.pad(stacked, ((0, 0), (0, Mp - M), (0, 0)))
    out = _max9_call(Mp, C, TMB)(stacked)
    if Mp != M:
        out = out[:M]
    return out.reshape(N, Ho, Wo, C)


# --------------------------------------------------------------------------
# Separable bilinear upsampling (align_corners=False) + fused sigmoid
# --------------------------------------------------------------------------
def _interp_matrix(in_size, out_size):
    m = np.zeros((out_size, in_size), np.float32)
    scale = in_size / out_size
    for i in range(out_size):
        src = max((i + 0.5) * scale - 0.5, 0.0)
        i0 = min(int(np.floor(src)), in_size - 1)
        i1 = min(i0 + 1, in_size - 1)
        l1 = src - i0
        m[i, i0] += 1.0 - l1
        m[i, i1] += l1
    return jnp.asarray(m)


def bilinear_resize_sigmoid(x, Ho, Wo):
    """x: (N,h,w,C) -> sigmoid(bilinear_resize(x)) as (N,Ho,Wo,C); separable."""
    N, h, w, C = x.shape
    Wh = _interp_matrix(h, Ho)                      # (Ho, h)
    Ww = _interp_matrix(w, Wo)                      # (Wo, w)

    # resize along H: y1[i, n, q, c] = sum_p Wh[i, p] x[n, p, q, c]
    xt = jnp.transpose(x, (1, 0, 2, 3)).reshape(h, N * w * C)
    y1 = fused_matmul(Wh[None], xt[None])           # (Ho, N*w*C)
    y1 = y1.reshape(Ho, N, w, C)

    # resize along W (+ fused sigmoid): y2[j, i, n, c] = sum_q Ww[j, q] y1[i, n, q, c]
    y1t = jnp.transpose(y1, (2, 0, 1, 3)).reshape(w, Ho * N * C)
    y2 = fused_matmul(Ww[None], y1t[None], sigmoid=True)   # (Wo, Ho*N*C), lane-dense
    y2 = y2.reshape(Wo, Ho, N, C)
    return jnp.transpose(y2, (2, 1, 0, 3))          # (N, Ho, Wo, C)


# --------------------------------------------------------------------------
# Parameter initialization (deterministic, synthetic)
# --------------------------------------------------------------------------
def init_params(seed=0):
    base = jax.random.PRNGKey(seed)
    cnt = [0]

    def nk():
        k = jax.random.fold_in(base, cnt[0])
        cnt[0] += 1
        return k

    def conv_w(kh, kw, cin, cout):
        # stored as (kh, kw, Cin, Cout) == transposed PyTorch (Cout, Cin, kh, kw)
        fan_in = kh * kw * cin
        return (jax.random.normal(nk(), (kh, kw, cin, cout), jnp.float32)
                * np.sqrt(2.0 / fan_in)).astype(jnp.float32)

    def bn(c):
        return dict(gamma=jnp.ones((c,), jnp.float32),
                    beta=jnp.zeros((c,), jnp.float32),
                    mean=jnp.zeros((c,), jnp.float32),
                    var=jnp.ones((c,), jnp.float32))

    params = {'conv1': conv_w(7, 7, 3, 64), 'bn1': bn(64)}

    # resnet101 backbone, replace_stride_with_dilation = [False, True, True]
    layers_spec = [(64, 3, 1, False), (128, 4, 2, False),
                   (256, 23, 2, True), (512, 3, 2, True)]
    inplanes, dilation = 64, 1
    layers, cfgs = [], []
    for planes, blocks, stride, dilate in layers_spec:
        prev_dil = dilation
        if dilate:
            dilation *= stride
            stride = 1
        layer_p, layer_c = [], []
        for b in range(blocks):
            cin = inplanes if b == 0 else planes * 4
            p = {'conv1': conv_w(1, 1, cin, planes), 'bn1': bn(planes),
                 'conv2': conv_w(3, 3, planes, planes), 'bn2': bn(planes),
                 'conv3': conv_w(1, 1, planes, planes * 4), 'bn3': bn(planes * 4)}
            if b == 0:
                s, d = stride, prev_dil
                if stride != 1 or inplanes != planes * 4:
                    p['down_conv'] = conv_w(1, 1, inplanes, planes * 4)
                    p['down_bn'] = bn(planes * 4)
            else:
                s, d = 1, dilation
            layer_p.append(p)
            layer_c.append((s, d))
        inplanes = planes * 4
        layers.append(layer_p)
        cfgs.append(layer_c)
    params['layers'] = layers
    params['layer_cfgs'] = cfgs

    # FCN head: Conv3x3(2048->512, no bias), BN, ReLU, Dropout, Conv1x1(512->num_classes)
    params['head_conv1'] = conv_w(3, 3, 2048, 512)
    params['head_bn'] = bn(512)
    params['head_conv2_w'] = conv_w(1, 1, 512, NUM_CLASSES)
    params['head_conv2_b'] = jnp.zeros((NUM_CLASSES,), jnp.float32)
    return params


# --------------------------------------------------------------------------
# Forward pass (mirrors torchvision fcn_resnet101 + the outer FCN_ResNet101 module)
# --------------------------------------------------------------------------
def bottleneck(x, p, stride, dilation):
    if 'down_conv' in p:
        identity = conv_bn(x, p['down_conv'], p['down_bn'], stride=stride)
    else:
        identity = x
    out = conv_bn(x, p['conv1'], p['bn1'], relu=True)
    out = conv_bn(out, p['conv2'], p['bn2'], stride=stride,
                  padding=dilation, dilation=dilation, relu=True)
    # conv3 + BN + residual add + ReLU fused into one matmul epilogue
    out = conv_bn(out, p['conv3'], p['bn3'], relu=True, residual=identity)
    return out


def fcn_resnet101_forward(params, x_nchw):
    x_nchw = x_nchw.astype(jnp.float32)
    N, C, H, W = x_nchw.shape
    if C != 3:
        x_nchw = jnp.concatenate([x_nchw, x_nchw, x_nchw], axis=1)
    x = jnp.transpose(x_nchw, (0, 2, 3, 1))          # NCHW -> NHWC

    # stem: conv7x7/s2 + BN + ReLU (fused), then 3x3/s2 max-pool
    x = conv_bn(x, params['conv1'], params['bn1'], stride=2, padding=3, relu=True)
    x = maxpool3x3_s2_p1(x)

    # residual layers
    for layer_p, layer_c in zip(params['layers'], params['layer_cfgs']):
        for bp, (s, d) in zip(layer_p, layer_c):
            x = bottleneck(x, bp, s, d)

    # FCN head
    x = conv_bn(x, params['head_conv1'], params['head_bn'], padding=1, relu=True)
    # TODO(synk): Dropout(0.1) is identity in eval mode; train-mode dropout and
    # batch-stat BatchNorm are not reproduced.
    x = conv_bn(x, params['head_conv2_w'], bias=params['head_conv2_b'])

    # upsample 'out' back to the input spatial size with the sigmoid fused in
    x = bilinear_resize_sigmoid(x, H, W)
    return jnp.transpose(x, (0, 3, 1, 2))            # back to NCHW


if __name__ == "__main__":
    key = jax.random.PRNGKey(0)
    x = jax.random.normal(key, (2, 1, 16, 16), jnp.float32)   # in_channels=1 (replicated to 3)

    params = init_params(seed=0)
    out = fcn_resnet101_forward(params, x)
    out = jax.block_until_ready(out)

    assert out.shape == (2, NUM_CLASSES, 16, 16), out.shape
    assert out.dtype == jnp.float32
    assert bool(jnp.all(jnp.isfinite(out)))
    assert bool(jnp.all((out >= 0.0) & (out <= 1.0)))
    print("KERNEL_OK")
</pallas_src>

<mosaic_0001>
module attributes {stable_mosaic.version = 11 : i64} {
  func.func @kernel(%arg0: i32, %arg1: i32, %arg2: i32, %arg3: i32, %arg4: memref<1x128x256xbf16, #tpu.memory_space<vmem>>, %arg5: memref<1x256x128xbf16, #tpu.memory_space<vmem>>, %arg6: memref<1x128xf32, #tpu.memory_space<vmem>>, %arg7: memref<1x128xf32, #tpu.memory_space<vmem>>, %arg8: memref<128x128xf32, #tpu.memory_space<vmem>>) attributes {dimension_semantics = [#tpu.dimension_semantics<parallel>, #tpu.dimension_semantics<parallel>, #tpu.dimension_semantics<arbitrary>, #tpu.dimension_semantics<arbitrary>], iteration_bounds = array<i64: 1, 1, 1, 1>, scalar_prefetch = 0 : i64, scratch_operands = 0 : i64, tpu.core_type = #tpu.core_type<tc>, window_params = [{transform_indices = @transform_0, window_bounds = array<i64: 1, 128, 256>}, {transform_indices = @transform_1, window_bounds = array<i64: 1, 256, 128>}, {transform_indices = @transform_2, window_bounds = array<i64: 1, 128>}, {transform_indices = @transform_3, window_bounds = array<i64: 1, 128>}, {transform_indices = @transform_4, window_bounds = array<i64: 128, 128>}]} {
    %c0_i32 = arith.constant 0 : i32
    %0 = arith.cmpi eq, %arg2, %c0_i32 : i32
    %c0_i32_0 = arith.constant 0 : i32
    %1 = arith.cmpi eq, %arg3, %c0_i32_0 : i32
    %2 = arith.andi %0, %1 : i1
    %3 = arith.extui %2 : i1 to i32
    %c0_i32_1 = arith.constant 0 : i32
    %4 = arith.cmpi ne, %3, %c0_i32_1 : i32
    scf.if %4 {
      %cst_14 = arith.constant 0.000000e+00 : f32
      %18 = vector.broadcast %cst_14 : f32 to vector<128x128xf32>
      %c0_15 = arith.constant 0 : index
      %c0_16 = arith.constant 0 : index
      %19 = vector.load %arg8[%c0_15, %c0_16] : memref<128x128xf32, #tpu.memory_space<vmem>>, vector<128x128xf32>
      tpu.vector_store %arg8[%c0_15, %c0_16], %18 {strides = array<i32>} : memref<128x128xf32, #tpu.memory_space<vmem>>, vector<128x128xf32>,
    } else {
    }
    %c0 = arith.constant 0 : index
    %c0_2 = arith.constant 0 : index
    %5 = vector.load %arg8[%c0, %c0_2] : memref<128x128xf32, #tpu.memory_space<vmem>>, vector<128x128xf32>
    %c0_3 = arith.constant 0 : index
    %c0_4 = arith.constant 0 : index
    %c0_5 = arith.constant 0 : index
    %6 = vector.load %arg4[%c0_3, %c0_4, %c0_5] : memref<1x128x256xbf16, #tpu.memory_space<vmem>>, vector<1x128x256xbf16>
    %7 = vector.shape_cast %6 : vector<1x128x256xbf16> to vector<128x256xbf16>
    %c0_6 = arith.constant 0 : index
    %c0_7 = arith.constant 0 : index
    %c0_8 = arith.constant 0 : index
    %8 = vector.load %arg5[%c0_6, %c0_7, %c0_8] : memref<1x256x128xbf16, #tpu.memory_space<vmem>>, vector<1x256x128xbf16>
    %9 = vector.shape_cast %8 : vector<1x256x128xbf16> to vector<256x128xbf16>
    %cst = arith.constant dense<0.000000e+00> : vector<128x128xf32>
    %10 = tpu.matmul %7, %9, %cst {dimension_numbers = #tpu.dot_dimension_numbers<[1], [0], [0], [1], [0, 0, 1, 1], [], []>} : vector<128x256xbf16>, vector<256x128xbf16>, vector<128x128xf32> -> vector<128x128xf32>
    %11 = arith.addf %5, %10 : vector<128x128xf32>
    %c0_9 = arith.constant 0 : index
    %c0_10 = arith.constant 0 : index
    %12 = vector.load %arg8[%c0_9, %c0_10] : memref<128x128xf32, #tpu.memory_space<vmem>>, vector<128x128xf32>
    tpu.vector_store %arg8[%c0_9, %c0_10], %11 {strides = array<i32>} : memref<128x128xf32, #tpu.memory_space<vmem>>, vector<128x128xf32>,
    %c0_i32_11 = arith.constant 0 : i32
    %13 = arith.cmpi eq, %arg2, %c0_i32_11 : i32
    %c0_i32_12 = arith.constant 0 : i32
    %14 = arith.cmpi eq, %arg3, %c0_i32_12 : i32
    %15 = arith.andi %13, %14 : i1
    %16 = arith.extui %15 : i1 to i32
    %c0_i32_13 = arith.constant 0 : i32
    %17 = arith.cmpi ne, %16, %c0_i32_13 : i32
    scf.if %17 {
      %c0_14 = arith.constant 0 : index
      %c0_15 = arith.constant 0 : index
      %18 = vector.load %arg8[%c0_14, %c0_15] : memref<128x128xf32, #tpu.memory_space<vmem>>, vector<128x128xf32>
      %c0_16 = arith.constant 0 : index
      %c0_17 = arith.constant 0 : index
      %19 = vector.load %arg6[%c0_16, %c0_17] : memref<1x128xf32, #tpu.memory_space<vmem>>, vector<1x128xf32>
      %20 = vector.broadcast %19 : vector<1x128xf32> to vector<128x128xf32>
      %21 = arith.mulf %18, %20 : vector<128x128xf32>
      %c0_18 = arith.constant 0 : index
      %c0_19 = arith.constant 0 : index
      %22 = vector.load %arg7[%c0_18, %c0_19] : memref<1x128xf32, #tpu.memory_space<vmem>>, vector<1x128xf32>
      %23 = vector.broadcast %22 : vector<1x128xf32> to vector<128x128xf32>
      %24 = arith.addf %21, %23 : vector<128x128xf32>
      %cst_20 = arith.constant 0.000000e+00 : f32
      %25 = vector.broadcast %cst_20 : f32 to vector<128x128xf32>
      %26 = arith.maximumf %24, %25 : vector<128x128xf32>
      %c0_21 = arith.constant 0 : index
      %c0_22 = arith.constant 0 : index
      %27 = vector.load %arg8[%c0_21, %c0_22] : memref<128x128xf32, #tpu.memory_space<vmem>>, vector<128x128xf32>
      tpu.vector_store %arg8[%c0_21, %c0_22], %26 {strides = array<i32>} : memref<128x128xf32, #tpu.memory_space<vmem>>, vector<128x128xf32>,
    } else {
    }
    return
  }
  func.func @transform_0(%arg0: i32, %arg1: i32, %arg2: i32, %arg3: i32) -> (i32, i32, i32) {
    %c0_i32 = arith.constant 0 : i32
    return %arg2, %arg0, %arg3 : i32, i32, i32
  }
  func.func @transform_1(%arg0: i32, %arg1: i32, %arg2: i32, %arg3: i32) -> (i32, i32, i32) {
    %c0_i32 = arith.constant 0 : i32
    return %arg2, %arg3, %arg1 : i32, i32, i32
  }
  func.func @transform_2(%arg0: i32, %arg1: i32, %arg2: i32, %arg3: i32) -> (i32, i32) {
    %c0_i32 = arith.constant 0 : i32
    %c0_i32_0 = arith.constant 0 : i32
    return %c0_i32, %arg1 : i32, i32
  }
  func.func @transform_3(%arg0: i32, %arg1: i32, %arg2: i32, %arg3: i32) -> (i32, i32) {
    %c0_i32 = arith.constant 0 : i32
    %c0_i32_0 = arith.constant 0 : i32
    return %c0_i32, %arg1 : i32, i32
  }
  func.func @transform_4(%arg0: i32, %arg1: i32, %arg2: i32, %arg3: i32) -> (i32, i32) {
    %c0_i32 = arith.constant 0 : i32
    return %arg0, %arg1 : i32, i32
  }
}

</mosaic_0001>

<bundles_post_ra>
// kernel: tpu_custom_call.1
= control target key start
LH: loop header
LB: loop body
LE: loop exit
PB: predicated region body
PF: predicated region fallthrough
CT: control target
= control target key end

     0   :  { %9 = vsyncpa [#allocation3], 0  ;;  %s902_s0 = inlined_call_operand.hbm [shape: bf16[1,128,256], index: 0, kind: input, shape index: {}]   ;;  %s903_s1 = inlined_call_operand.hbm [shape: bf16[1,256,128], index: 1, kind: input, shape index: {}]   ;;  %s904_s2 = inlined_call_operand.vmem [shape: f32[1,128], index: 2, kind: input, shape index: {}]   ;;  %s905_s3 = inlined_call_operand.vmem [shape: f32[1,128], index: 3, kind: input, shape index: {}]   ;;  %s906_s4 = inlined_call_operand.hbm [shape: f32[128,128], index: 4, kind: output, shape index: {}]  }
   0x1   :  { %10 = vsyncpa [#allocation6], 0 }
   0x2   :  { %11 = vsyncpa [#allocation4], 0  ;;  %s786_s15 = smov [#allocation2]   ;;  %s714_s19 = scalar_lea.hbm %s902_s0, 2048 }
   0x3   :  { %s17_s16 = sshll.u32 %s786_s15, 4  ;;  %p715_p0 = scmp.ne.s32.totalorder %s902_s0, %s714_s19  ;;  %s18_s16 = int_to_ptr.vmem [resolvable:$true] %s17_s16 }
   0x4   :  { %p718_p1 = scmp.lt.u32.totalorder %s714_s19, %s902_s0 }
   0x6   :  { %p720_p2 = pnand %p718_p1, %p715_p0 }
   0x8   :  { %723 = shalt.err (!%p720_p2)
}
   0x9   :  { %s724_s24 = scalar_lea.vmem %s18_s16, 2048  ;;  %p729_p4 = scmp.lt.s32.totalorder %s18_s16, %s18_s16 }
   0xa   :  { %p725_p3 = scmp.ne.s32.totalorder %s18_s16, %s724_s24  ;;  %p730_p5 = scmp.lt.s32.totalorder %s724_s24, %s724_s24 }
   0xc   :  { %p731_p6 = por %p730_p5, %p729_p4 }
   0xe   :  { %p732_p7 = pnand %p731_p6, %p725_p3 }
  0x10   :  { %735 = shalt.err (!%p732_p7)
}
  0x11   :  { %s787_s25 = smov 128   ;;  %s788_s26 = smov 8  }
  0x12   :  { %23 = dma.hbm_to_vmem [thread:$0]  %s902_s0, 2048, %s18_s16, [#allocation3], %s787_s25, %s787_s25, %s788_s26  }
  0x13   :  { %s789_s29 = smov [#allocation5]   ;;  %s736_s7 = scalar_lea.hbm %s903_s1, 2048 }
  0x14   :  { %s29_s30 = sshll.u32 %s789_s29, 4  ;;  %p737_p8 = scmp.ne.s32.totalorder %s903_s1, %s736_s7  ;;  %s30_s30 = int_to_ptr.vmem [resolvable:$true] %s29_s30 }
  0x15   :  { %p740_p9 = scmp.lt.u32.totalorder %s736_s7, %s903_s1 }
  0x17   :  { %p742_p10 = pnand %p740_p9, %p737_p8 }
  0x19   :  { %745 = shalt.err (!%p742_p10)
}
  0x1a   :  { %s746_s12 = scalar_lea.vmem %s30_s30, 2048  ;;  %p751_p12 = scmp.lt.s32.totalorder %s30_s30, %s30_s30 }
  0x1b   :  { %p747_p11 = scmp.ne.s32.totalorder %s30_s30, %s746_s12  ;;  %p752_p13 = scmp.lt.s32.totalorder %s746_s12, %s746_s12 }
  0x1d   :  { %p753_p0 = por %p752_p13, %p751_p12 }
  0x1f   :  { %p754_p1 = pnand %p753_p0, %p747_p11 }
  0x21   :  { %757 = shalt.err (!%p754_p1)
}
  0x22   :  { %s790_s0 = smov 64   ;;  %s791_s13 = smov 4  }
  0x23   :  { %35 = dma.hbm_to_vmem [thread:$0]  %s903_s1, 2048, %s30_s30, [#allocation6], %s790_s0, %s790_s0, %s791_s13  }
  0x24   :  { %780 = dma.done.wait [#allocation3], 2048  }
  0x25   :  { %781 = vsyncadd [#allocation3], 4294965248 }
  0x26   :  { %782 = dma.done.wait [#allocation6], 2048  }
  0x27   :  { %783 = vsyncadd [#allocation6], 4294965248  ;;  %v674_v0 = vld [vmem:[#allocation5 + $0x40] sm:$0xff]   ;;  %v676_v2 = vld [vmem:[#allocation5 + $0x48] sm:$0xff]  }
  0x28   :  { %v675_v1 = vld [vmem:[#allocation5] sm:$0xff]   ;;  %586 = vmatprep.subr.bf16.mxu0 %v674_v0  ;;  %650 = vmatprep.subr.bf16.mxu1 %v674_v0  ;;  %v677_v3 = vld [vmem:[#allocation5 + $0x8] sm:$0xff]   ;;  %v678_v4 = vld [vmem:[#allocation5 + $0x50] sm:$0xff]  }
  0x29   :  { %587 = vmatpush3.bf16.msra.mxu0 %v675_v1  ;;  %658 = vmatpush3.bf16.msra.mxu1 %v675_v1  ;;  %v679_v5 = vld [vmem:[#allocation5 + $0x10] sm:$0xff]   ;;  %v680_v6 = vld [vmem:[#allocation5 + $0x58] sm:$0xff]   ;;  %v682_v8 = vld [vmem:[#allocation5 + $0x60] sm:$0xff]  }
  0x2a   :  { %588 = vmatprep.subr.bf16.mxu0 %v676_v2  ;;  %651 = vmatprep.subr.bf16.mxu1 %v676_v2  ;;  %v681_v7 = vld [vmem:[#allocation5 + $0x18] sm:$0xff]   ;;  %v683_v9 = vld [vmem:[#allocation5 + $0x20] sm:$0xff]   ;;  %v684_v10 = vld [vmem:[#allocation5 + $0x68] sm:$0xff]  }
  0x2b   :  { %v692_v11 = vld [vmem:[#allocation2 + $0x4] ss:$8 sps:$4 sm:$0xff]   ;;  %v686_v14 = vld [vmem:[#allocation5 + $0x70] sm:$0xff]   ;;  %v688_v16 = vld [vmem:[#allocation5 + $0x78] sm:$0xff]  }
  0x2c   :  { %v695_v12 = vld [vmem:[#allocation2 + $0x44] ss:$8 sps:$4 sm:$0xff]   ;;  %341 = vmatprep.mubr.bf16.mxu0 %v692_v11  ;;  %v687_v15 = vld [vmem:[#allocation5 + $0x30] sm:$0xff]   ;;  %v689_v17 = vld [vmem:[#allocation5 + $0x38] sm:$0xff]  }
  0x2d   :  { %589 = vmatpush3.bf16.msra.mxu0 %v677_v3  ;;  %659 = vmatpush3.bf16.msra.mxu1 %v677_v3  ;;  %v685_v13 = vld [vmem:[#allocation5 + $0x28] sm:$0xff]   ;;  %v696_v20 = vld [vmem:[#allocation2 + $0x14] ss:$8 sps:$4 sm:$0xff]   ;;  %v700_v22 = vld [vmem:[#allocation2 + $0x10] ss:$8 sps:$4 sm:$0xff]  }
  0x2e   :  { %590 = vmatprep.subr.bf16.mxu0 %v678_v4  ;;  %652 = vmatprep.subr.bf16.mxu1 %v678_v4  ;;  %v690_v18 = vld [vmem:[#allocation2] ss:$8 sps:$4 sm:$0xff]   ;;  %v698_v21 = vld [vmem:[#allocation2 + $0x54] ss:$8 sps:$4 sm:$0xff]   ;;  %v701_v23 = vld [vmem:[#allocation2 + $0x50] ss:$8 sps:$4 sm:$0xff]  }
  0x2f   :  { %373 = vmatprep.mubr.bf16.mxu1 %v695_v12  ;;  %v693_v19 = vld [vmem:[#allocation2 + $0x40] ss:$8 sps:$4 sm:$0xff]   ;;  %v702_v24 = vld [vmem:[#allocation2 + $0x24] ss:$8 sps:$4 sm:$0xff]   ;;  %v708_v28 = vld [vmem:[#allocation2 + $0x34] ss:$8 sps:$4 sm:$0xff]  }
  0x30   :  { %v704_v25 = vld [vmem:[#allocation2 + $0x64] ss:$8 sps:$4 sm:$0xff]   ;;  %v706_v26 = vld [vmem:[#allocation2 + $0x20] ss:$8 sps:$4 sm:$0xff]   ;;  %v710_v29 = vld [vmem:[#allocation2 + $0x74] ss:$8 sps:$4 sm:$0xff]  }
  0x31   :  { %591 = vmatpush3.bf16.msra.mxu0 %v679_v5  ;;  %660 = vmatpush3.bf16.msra.mxu1 %v679_v5  ;;  %v707_v27 = vld [vmem:[#allocation2 + $0x60] ss:$8 sps:$4 sm:$0xff]   ;;  %v712_v30 = vld [vmem:[#allocation2 + $0x30] ss:$8 sps:$4 sm:$0xff]  }
  0x32   :  { %592 = vmatprep.subr.bf16.mxu0 %v680_v6  ;;  %653 = vmatprep.subr.bf16.mxu1 %v680_v6  ;;  %v713_v31 = vld [vmem:[#allocation2 + $0x70] ss:$8 sps:$4 sm:$0xff]   ;;  %v848_v40 = vld [vmem:[%s904_s2] ss:$0 sm:$0xff]  ;;  %s792_s2 = smov [#allocation7]  }
  0x33   :  { %v853_v45 = vld [vmem:[%s905_s3] ss:$0 sm:$0xff]  ;;  %s539_s3 = sshll.u32 %s792_s2, 4  ;;  %s540_s3 = int_to_ptr.vmem [resolvable:$true] %s539_s3 }
  0x34   :  { %s758_s19 = scalar_lea.vmem %s540_s3, 2048  ;;  %p763_p3 = scmp.lt.s32.totalorder %s540_s3, %s540_s3 }
  0x35   :  { %593 = vmatpush3.bf16.msra.mxu0 %v681_v7  ;;  %661 = vmatpush3.bf16.msra.mxu1 %v681_v7  ;;  %p759_p2 = scmp.ne.s32.totalorder %s540_s3, %s758_s19  ;;  %p764_p4 = scmp.lt.s32.totalorder %s758_s19, %s758_s19 }
  0x36   :  { %594 = vmatprep.subr.bf16.mxu0 %v682_v8  ;;  %654 = vmatprep.subr.bf16.mxu1 %v682_v8 }
  0x37   :  { %p765_p5 = por %p764_p4, %p763_p3 }
  0x39   :  { %595 = vmatpush3.bf16.msra.mxu0 %v683_v9  ;;  %662 = vmatpush3.bf16.msra.mxu1 %v683_v9  ;;  %p766_p6 = pnand %p765_p5, %p759_p2 }
  0x3a   :  { %596 = vmatprep.subr.bf16.mxu0 %v684_v10  ;;  %655 = vmatprep.subr.bf16.mxu1 %v684_v10 }
  0x3d   :  { %597 = vmatpush3.bf16.msra.mxu0 %v685_v13  ;;  %663 = vmatpush3.bf16.msra.mxu1 %v685_v13 }
  0x3e   :  { %598 = vmatprep.subr.bf16.mxu0 %v686_v14  ;;  %656 = vmatprep.subr.bf16.mxu1 %v686_v14 }
  0x41   :  { %599 = vmatpush3.bf16.msra.mxu0 %v687_v15  ;;  %664 = vmatpush3.bf16.msra.mxu1 %v687_v15 }
  0x42   :  { %600 = vmatprep.subr.bf16.mxu0 %v688_v16  ;;  %657 = vmatprep.subr.bf16.mxu1 %v688_v16 }
  0x45   :  { %601 = vmatpush3.bf16.msra.mxu0 %v689_v17  ;;  %665 = vmatpush3.bf16.msra.mxu1 %v689_v17 }
  0x48   :  { %342 = vmatmul.mubr.bf16.vlgmr.msra.gmra.mrb[0].mxu0 %v690_v18  ;;  %374 = vmatmul.mubr.bf16.vlgmr.msra.gmra.mrb[0].mxu1 %v693_v19 }
  0x49   :  { %349 = vmatprep.mubr.bf16.mxu0 %v696_v20  ;;  %381 = vmatprep.mubr.bf16.mxu1 %v698_v21 }
  0x50   :  { %350 = vmatmul.mubr.bf16.gmra.mrb[4].mxu0 %v700_v22  ;;  %382 = vmatmul.mubr.bf16.gmra.mrb[4].mxu1 %v701_v23 }
  0x51   :  { %357 = vmatprep.mubr.bf16.mxu0 %v702_v24  ;;  %389 = vmatprep.mubr.bf16.mxu1 %v704_v25 }
  0x58   :  { %358 = vmatmul.mubr.bf16.gmra.mrb[8].mxu0 %v706_v26  ;;  %390 = vmatmul.mubr.bf16.gmra.mrb[8].mxu1 %v707_v27 }
  0x59   :  { %365 = vmatprep.mubr.bf16.mxu0 %v708_v28  ;;  %397 = vmatprep.mubr.bf16.mxu1 %v710_v29 }
  0x60   :  { %366 = vmatmul.mubr.bf16.gmra.mrb[12].mxu0 %v712_v30  ;;  %398 = vmatmul.mubr.bf16.gmra.mrb[12].mxu1 %v713_v31 }
 0x11b   :  { %v602_v32 = vpop.f32.mrb[0].mxu0  ;;  %v626_v33 = vpop.f32.mrb[0].mxu1 }
 0x11c   :  { %v603_v34 = vpop.f32.mrb[1].mxu0  ;;  %v627_v35 = vpop.f32.mrb[1].mxu1 }
 0x11d   :  { %v604_v36 = vadd.f32 %v603_v34, %v602_v32  ;;  %v628_v37 = vadd.f32 %v627_v35, %v626_v33  ;;  %v605_v38 = vpop.f32.mrb[2].mxu0  ;;  %v629_v39 = vpop.f32.mrb[2].mxu1 }
 0x11e   :  { %v606_v41 = vpop.f32.mrb[3].mxu0  ;;  %v630_v42 = vpop.f32.mrb[3].mxu1 }
 0x11f   :  { %v607_v43 = vadd.f32 %v606_v41, %v605_v38  ;;  %v631_v44 = vadd.f32 %v630_v42, %v629_v39  ;;  %v463_v46 = vmul.f32 %v604_v36, %v848_v40  ;;  %v471_v47 = vmul.f32 %v628_v37, %v848_v40 }
 0x121   :  { %v486_v48 = vadd.f32 %v853_v45, %v463_v46  ;;  %v494_v49 = vadd.f32 %v853_v45, %v471_v47  ;;  %v464_v50 = vmul.f32 %v607_v43, %v848_v40  ;;  %v472_v51 = vmul.f32 %v631_v44, %v848_v40 }
 0x123   :  { %v608_v52 = vpop.f32.mrb[4].mxu0  ;;  %v632_v53 = vpop.f32.mrb[4].mxu1  ;;  %v502_v56 = vmax.f32 %v486_v48, 0.0  ;;  %v510_v57 = vmax.f32 %v494_v49, 0.0  ;;  %v487_v58 = vadd.f32 %v853_v45, %v464_v50  ;;  %v495_v59 = vadd.f32 %v853_v45, %v472_v51 }
 0x124   :  { %v609_v54 = vpop.f32.mrb[5].mxu0  ;;  %v633_v55 = vpop.f32.mrb[5].mxu1 }
 0x125   :  { %v611_v60 = vpop.f32.mrb[6].mxu0  ;;  %v635_v61 = vpop.f32.mrb[6].mxu1  ;;  %v610_v62 = vadd.f32 %v609_v54, %v608_v52  ;;  %v634_v63 = vadd.f32 %v633_v55, %v632_v53  ;;  %518 = vst [vmem:[#allocation7] sm:$0xff] %v502_v56  ;;  %526 = vst [vmem:[#allocation7 + $0x40] sm:$0xff] %v510_v57  ;;  %v503_v2 = vmax.f32 %v487_v58, 0.0  ;;  %v511_v3 = vmax.f32 %v495_v59, 0.0 }
 0x126   :  { %v612_v0 = vpop.f32.mrb[7].mxu0  ;;  %v636_v1 = vpop.f32.mrb[7].mxu1 }
 0x127   :  { %v613_v4 = vadd.f32 %v612_v0, %v611_v60  ;;  %v637_v5 = vadd.f32 %v636_v1, %v635_v61  ;;  %519 = vst [vmem:[#allocation7 + $0x8] sm:$0xff] %v503_v2  ;;  %527 = vst [vmem:[#allocation7 + $0x48] sm:$0xff] %v511_v3  ;;  %v465_v6 = vmul.f32 %v610_v62, %v848_v40 }
 0x128   :  { %v473_v7 = vmul.f32 %v634_v63, %v848_v40 }
 0x129   :  { %v466_v8 = vmul.f32 %v613_v4, %v848_v40  ;;  %v474_v9 = vmul.f32 %v637_v5, %v848_v40  ;;  %v488_v12 = vadd.f32 %v853_v45, %v465_v6 }
 0x12a   :  { %v496_v13 = vadd.f32 %v853_v45, %v473_v7 }
 0x12b   :  { %v614_v10 = vpop.f32.mrb[8].mxu0  ;;  %v638_v11 = vpop.f32.mrb[8].mxu1  ;;  %v489_v16 = vadd.f32 %v853_v45, %v466_v8  ;;  %v497_v17 = vadd.f32 %v853_v45, %v474_v9  ;;  %v504_v22 = vmax.f32 %v488_v12, 0.0 }
 0x12c   :  { %v615_v14 = vpop.f32.mrb[9].mxu0  ;;  %v639_v15 = vpop.f32.mrb[9].mxu1  ;;  %v512_v23 = vmax.f32 %v496_v13, 0.0 }
 0x12d   :  { %v616_v18 = vadd.f32 %v615_v14, %v614_v10  ;;  %v640_v19 = vadd.f32 %v639_v15, %v638_v11  ;;  %v617_v20 = vpop.f32.mrb[10].mxu0  ;;  %v641_v21 = vpop.f32.mrb[10].mxu1  ;;  %v505_v26 = vmax.f32 %v489_v16, 0.0  ;;  %v513_v27 = vmax.f32 %v497_v17, 0.0  ;;  %520 = vst [vmem:[#allocation7 + $0x10] sm:$0xff] %v504_v22 }
 0x12e   :  { %v618_v24 = vpop.f32.mrb[11].mxu0  ;;  %v642_v25 = vpop.f32.mrb[11].mxu1  ;;  %528 = vst [vmem:[#allocation7 + $0x50] sm:$0xff] %v512_v23 }
 0x12f   :  { %v619_v28 = vadd.f32 %v618_v24, %v617_v20  ;;  %v643_v29 = vadd.f32 %v642_v25, %v641_v21  ;;  %521 = vst [vmem:[#allocation7 + $0x18] sm:$0xff] %v505_v26  ;;  %529 = vst [vmem:[#allocation7 + $0x58] sm:$0xff] %v513_v27  ;;  %v467_v30 = vmul.f32 %v616_v18, %v848_v40 }
 0x130   :  { %v475_v31 = vmul.f32 %v640_v19, %v848_v40 }
 0x131   :  { %v490_v32 = vadd.f32 %v853_v45, %v467_v30  ;;  %v468_v36 = vmul.f32 %v619_v28, %v848_v40  ;;  %v476_v37 = vmul.f32 %v643_v29, %v848_v40 }
 0x132   :  { %v498_v33 = vadd.f32 %v853_v45, %v475_v31 }
 0x133   :  { %v620_v34 = vpop.f32.mrb[12].mxu0  ;;  %v644_v35 = vpop.f32.mrb[12].mxu1  ;;  %v506_v41 = vmax.f32 %v490_v32, 0.0  ;;  %v491_v48 = vadd.f32 %v853_v45, %v468_v36  ;;  %v499_v49 = vadd.f32 %v853_v45, %v476_v37 }
 0x134   :  { %v621_v38 = vpop.f32.mrb[13].mxu0  ;;  %v645_v39 = vpop.f32.mrb[13].mxu1  ;;  %v514_v42 = vmax.f32 %v498_v33, 0.0 }
 0x135   :  { %v622_v43 = vadd.f32 %v621_v38, %v620_v34  ;;  %v646_v44 = vadd.f32 %v645_v39, %v644_v35  ;;  %v623_v46 = vpop.f32.mrb[14].mxu0  ;;  %v647_v47 = vpop.f32.mrb[14].mxu1  ;;  %522 = vst [vmem:[#allocation7 + $0x20] sm:$0xff] %v506_v41  ;;  %v507_v54 = vmax.f32 %v491_v48, 0.0  ;;  %v515_v55 = vmax.f32 %v499_v49, 0.0 }
 0x136   :  { %v624_v50 = vpop.f32.mrb[15].mxu0  ;;  %v648_v51 = vpop.f32.mrb[15].mxu1  ;;  %530 = vst [vmem:[#allocation7 + $0x60] sm:$0xff] %v514_v42 }
 0x137   :  { %v625_v52 = vadd.f32 %v624_v50, %v623_v46  ;;  %v649_v53 = vadd.f32 %v648_v51, %v647_v47  ;;  %v469_v56 = vmul.f32 %v622_v43, %v848_v40  ;;  %v477_v57 = vmul.f32 %v646_v44, %v848_v40  ;;  %523 = vst [vmem:[#allocation7 + $0x28] sm:$0xff] %v507_v54 }
 0x138   :  { %531 = vst [vmem:[#allocation7 + $0x68] sm:$0xff] %v515_v55 }
 0x139   :  { %v492_v58 = vadd.f32 %v853_v45, %v469_v56  ;;  %v500_v59 = vadd.f32 %v853_v45, %v477_v57  ;;  %v470_v60 = vmul.f32 %v625_v52, %v848_v40  ;;  %v478_v61 = vmul.f32 %v649_v53, %v848_v40 }
 0x13b   :  { %v508_v62 = vmax.f32 %v492_v58, 0.0  ;;  %v516_v63 = vmax.f32 %v500_v59, 0.0  ;;  %v493_v0 = vadd.f32 %v853_v45, %v470_v60  ;;  %v501_v1 = vadd.f32 %v853_v45, %v478_v61 }
 0x13d   :  { %524 = vst [vmem:[#allocation7 + $0x30] sm:$0xff] %v508_v62  ;;  %532 = vst [vmem:[#allocation7 + $0x70] sm:$0xff] %v516_v63  ;;  %v509_v2 = vmax.f32 %v493_v0, 0.0  ;;  %v517_v3 = vmax.f32 %v501_v1, 0.0 }
 0x13f   :  { %525 = vst [vmem:[#allocation7 + $0x38] sm:$0xff] %v509_v2  ;;  %533 = vst [vmem:[#allocation7 + $0x78] sm:$0xff] %v517_v3 }
 0x140   :  { %769 = shalt.err (!%p766_p6)
}
 0x141   :  { %s770_s22 = scalar_lea.hbm %s906_s4, 2048 }
 0x142   :  { %p771_p7 = scmp.ne.s32.totalorder %s906_s4, %s770_s22  ;;  %p774_p8 = scmp.lt.u32.totalorder %s770_s22, %s906_s4 }
 0x144   :  { %p776_p9 = pnand %p774_p8, %p771_p7 }
 0x146   :  { %779 = shalt.err (!%p776_p9)
}
 0x147   :  { %545 = dma.vmem_to_hbm [thread:$0]  %s540_s3, 2048, %s906_s4, [#allocation4], %s787_s25, %s787_s25, %s788_s26  }
 0x148   :  { %784 = dma.done.wait [#allocation4], 2048  }
 0x149   :  { %785 = vsyncadd [#allocation4], 4294965248 }
 0x14a   :  { %549 = vsyncpa [#allocation3], 1 }
 0x14b   :  { %550 = vsyncpa [#allocation6], 1 }
 0x14c   :  { %551 = vsyncpa [#allocation4], 1 }

</bundles_post_ra>
